<compile_context>
chip_gen: v7x
topology: tpu7x:2x2x1
jax: 0.10.0
libtpu: 0.0.40
codegen_flags: <defaults>
</compile_context>

<pallas_src>
import functools

import jax
import jax.numpy as jnp
import numpy as np
from jax import lax
from jax.experimental import pallas as pl
from jax.experimental.pallas import tpu as pltpu


# ---------------------------------------------------------------------------
# Lane-roll helper: we need shifted[..., c] = v[..., c - s] (numpy.roll
# convention, with wraparound). A one-time probe resolves pltpu.roll's
# rotation direction; "emulate" falls back to jnp.roll (slice + concat).
# ---------------------------------------------------------------------------
@functools.cache
def _roll_mode():
    def _probe_kernel(x_ref, o_ref):
        o_ref[...] = pltpu.roll(x_ref[...], shift=1, axis=1)

    try:
        x = jnp.arange(8 * 128, dtype=jnp.float32).reshape(8, 128)
        y = pl.pallas_call(
            _probe_kernel,
            out_shape=jax.ShapeDtypeStruct((8, 128), jnp.float32),
        )(x)
        y = jax.block_until_ready(y)
        return "np" if bool(y[0, 1] == x[0, 0]) else "rev"
    except Exception:
        return "emulate"


def _lane_roll(v, shift, mode):
    """shifted[:, c] = v[:, c - shift] (wraparound) along the last axis of a 2D array."""
    size = v.shape[-1]
    if mode == "np":
        return pltpu.roll(v, shift=shift, axis=1)
    if mode == "rev":
        return pltpu.roll(v, shift=size - shift, axis=1)
    return jnp.roll(v, shift, axis=1)  # guaranteed semantics; slices + lane concat


def _tile_lanes(v, reps):
    """Concatenate `reps` copies of v (..., n) along lanes -> (..., n*reps).

    Uses log2(reps) pairwise lane concats (cheaper + friendlier to lower than a
    single reps-operand concatenate).
    """
    target = v.shape[-1] * reps
    out = v
    while out.shape[-1] < target:
        out = jnp.concatenate([out, out], axis=-1)
    if out.shape[-1] != target:
        out = out[..., :target]
    return out


# ---------------------------------------------------------------------------
# Kernel
# ---------------------------------------------------------------------------
def _dense_max_pool_kernel(x_ref, o_ref, *, N, roll_mode):
    # x_ref: (1, tD, N) VMEM block; o_ref: (1, tD, N*N) VMEM block.
    # Output lane c encodes the (i, j) cell as c = i*N + j (lane-dense store).
    x = x_ref[0]                                   # (tD, N); dtype preserved
    NN = N * N
    neg_inf = jnp.array(-jnp.inf, dtype=x.dtype)

    # Lane-index helpers, built once at (1, NN) and broadcast inside the selects.
    c_idx = lax.broadcasted_iota(jnp.int32, (1, NN), 1)                  # c
    j_idx = _tile_lanes(lax.broadcasted_iota(jnp.int32, (1, N), 1), N)   # j = c mod N
    # j >= i  <=>  (N+1)*j >= i*N + j = c   (avoids int div/mod on the VPU)
    upper = (N + 1) * j_idx >= c_idx                                     # (1, NN) bool

    # y0[d, i*N + j] = x[d, j] on/above the diagonal, -inf strictly below it.
    y = jnp.where(upper, _tile_lanes(x, N), neg_inf)                     # (tD, NN)

    # Hillis-Steele running max along j within each length-N row segment.
    # After all ceil(log2(N)) steps: y[d, i*N + j] = max(x[d, i : j+1]) for j >= i.
    # Lanes with j < s would pull values from the previous row segment (or from
    # the roll's wraparound), so they are excluded from the update.
    s = 1
    while s < N:
        shifted = _lane_roll(y, s, roll_mode)                            # shifted[c] = y[c - s]
        y = jnp.where(j_idx >= s, jnp.maximum(y, shifted), y)
        s *= 2

    # Zero the lower triangle (torch leaves it at 0) and store lane-dense.
    o_ref[0] = jnp.where(upper, y, jnp.zeros((), x.dtype))


# ---------------------------------------------------------------------------
# Tiling / wrapper
# ---------------------------------------------------------------------------
def _pick_tile_d(D, N, itemsize, target_block_bytes=4 << 20):
    """Largest tD dividing D whose (tD, N*N) output block stays under ~4 MiB.

    ~4 MiB output blocks leave ample headroom for double buffering plus the
    in-kernel working set even under v7x's 64 MiB VMEM / 32 MiB default scoped
    limit, while staying far above the per-grid-step overhead floor.
    A partial block's sublane dim must be a multiple of 8, so prefer those.
    """
    max_td = max(1, target_block_bytes // (N * N * itemsize))
    if D <= max_td:
        return D
    for td in range(min(D, max_td), 0, -1):
        if td % 8 == 0 and D % td == 0:
            return td
    # No small multiple-of-8 divisor: take the smallest that exists, else all of D.
    for td in range(8, D, 8):
        if D % td == 0:
            return td
    return D


def dense_max_pool(x):
    """x: (B, D, N) -> (map2d (B, D, N, N), mask2d (N, N) bool)."""
    B, D, N = x.shape
    NN = N * N
    tD = _pick_tile_d(D, N, x.dtype.itemsize)
    roll_mode = _roll_mode()

    kernel = functools.partial(_dense_max_pool_kernel, N=N, roll_mode=roll_mode)

    flat = pl.pallas_call(
        kernel,
        out_shape=jax.ShapeDtypeStruct((B, D, NN), x.dtype),
        grid_spec=pltpu.PrefetchScalarGridSpec(
            num_scalar_prefetch=0,
            grid=(B, D // tD),
            in_specs=[pl.BlockSpec((1, tD, N), lambda b, d: (b, d, 0))],
            out_specs=pl.BlockSpec((1, tD, NN), lambda b, d: (b, d, 0)),
        ),
        compiler_params=pltpu.CompilerParams(
            # Both grid axes are independent -> megacore / 2-TC sharding on v7x.
            dimension_semantics=("parallel", "parallel"),
        ),
    )(x)

    # (B, D, N*N) -> (B, D, N, N) is a free row-major view outside the kernel.
    map2d = flat.reshape(B, D, N, N)
    # mask2d is the constant the torch module builds in __init__.
    mask2d = jnp.triu(jnp.ones((N, N), dtype=jnp.bool_))
    return map2d, mask2d


# ---------------------------------------------------------------------------
# Reference + self-check
# ---------------------------------------------------------------------------
def _reference(x):
    """Pure numpy reference matching the PyTorch forward."""
    x = np.asarray(x)
    B, D, N = x.shape
    map2d = np.zeros((B, D, N, N), dtype=x.dtype)
    for i in range(N):
        for j in range(i, N):
            map2d[:, :, i, j] = x[:, :, i:j + 1].max(axis=-1)
    mask2d = np.triu(np.ones((N, N), dtype=bool))
    return map2d, mask2d


if __name__ == "__main__":
    key = jax.random.PRNGKey(0)
    B, D, N = 2, 4, 16
    x = jax.random.normal(key, (B, D, N), dtype=jnp.float32)

    map2d, mask2d = dense_max_pool(x)
    map2d = jax.block_until_ready(map2d)
    mask2d = jax.block_until_ready(mask2d)

    ref_map2d, ref_mask2d = _reference(x)
    np.testing.assert_allclose(np.asarray(map2d), ref_map2d, rtol=1e-6, atol=1e-6)
    np.testing.assert_array_equal(np.asarray(mask2d), ref_mask2d)

    print("KERNEL_OK")
</pallas_src>

<mosaic_0001>
module attributes {stable_mosaic.version = 11 : i64} {
  func.func @_probe_kernel(%arg0: memref<8x128xf32, #tpu.memory_space<vmem>>, %arg1: memref<8x128xf32, #tpu.memory_space<vmem>>) attributes {dimension_semantics = [], scalar_prefetch = 0 : i64, scratch_operands = 0 : i64, tpu.core_type = #tpu.core_type<tc>} {
    %c0 = arith.constant 0 : index
    %c0_0 = arith.constant 0 : index
    %0 = vector.load %arg0[%c0, %c0_0] : memref<8x128xf32, #tpu.memory_space<vmem>>, vector<8x128xf32>
    %c1_i32 = arith.constant 1 : i32
    %1 = tpu.dynamic_rotate %0 by %c1_i32 dim 1 : vector<8x128xf32>, i32 -> vector<8x128xf32>
    %c0_1 = arith.constant 0 : index
    %c0_2 = arith.constant 0 : index
    %2 = vector.load %arg1[%c0_1, %c0_2] : memref<8x128xf32, #tpu.memory_space<vmem>>, vector<8x128xf32>
    tpu.vector_store %arg1[%c0_1, %c0_2], %1 {strides = array<i32>} : memref<8x128xf32, #tpu.memory_space<vmem>>, vector<8x128xf32>,
    return
  }
}

module attributes {stable_mosaic.version = 11 : i64} {
  func.func @_dense_max_pool_kernel(%arg0: i32, %arg1: i32, %arg2: memref<1x4x16xf32, #tpu.memory_space<vmem>>, %arg3: memref<1x4x256xf32, #tpu.memory_space<vmem>>) attributes {dimension_semantics = [#tpu.dimension_semantics<parallel>, #tpu.dimension_semantics<parallel>], iteration_bounds = array<i64: 2, 1>, scalar_prefetch = 0 : i64, scratch_operands = 0 : i64, tpu.core_type = #tpu.core_type<tc>, window_params = [{transform_indices = @transform_0, window_bounds = array<i64: 1, 4, 16>}, {transform_indices = @transform_1, window_bounds = array<i64: 1, 4, 256>}]} {
    %c0 = arith.constant 0 : index
    %c0_0 = arith.constant 0 : index
    %c0_1 = arith.constant 0 : index
    %0 = vector.load %arg2[%c0, %c0_0, %c0_1] : memref<1x4x16xf32, #tpu.memory_space<vmem>>, vector<1x4x16xf32>
    %1 = vector.shape_cast %0 : vector<1x4x16xf32> to vector<4x16xf32>
    %2 = tpu.iota {dimensions = array<i32: 1>} : vector<1x256xi32>
    %3 = tpu.iota {dimensions = array<i32: 1>} : vector<1x16xi32>
    %4 = tpu.concatenate %3, %3 in 1 : vector<1x16xi32>, vector<1x16xi32> -> vector<1x32xi32>
    %5 = tpu.concatenate %4, %4 in 1 : vector<1x32xi32>, vector<1x32xi32> -> vector<1x64xi32>
    %6 = tpu.concatenate %5, %5 in 1 : vector<1x64xi32>, vector<1x64xi32> -> vector<1x128xi32>
    %7 = tpu.concatenate %6, %6 in 1 : vector<1x128xi32>, vector<1x128xi32> -> vector<1x256xi32>
    %c17_i32 = arith.constant 17 : i32
    %8 = vector.broadcast %c17_i32 : i32 to vector<1x256xi32>
    %9 = arith.muli %8, %7 : vector<1x256xi32>
    %10 = arith.cmpi sge, %9, %2 : vector<1x256xi32>
    %11 = tpu.concatenate %1, %1 in 1 : vector<4x16xf32>, vector<4x16xf32> -> vector<4x32xf32>
    %12 = tpu.concatenate %11, %11 in 1 : vector<4x32xf32>, vector<4x32xf32> -> vector<4x64xf32>
    %13 = tpu.concatenate %12, %12 in 1 : vector<4x64xf32>, vector<4x64xf32> -> vector<4x128xf32>
    %14 = tpu.concatenate %13, %13 in 1 : vector<4x128xf32>, vector<4x128xf32> -> vector<4x256xf32>
    %cst = arith.constant 0xFF800000 : f32
    %15 = vector.shape_cast %10 : vector<1x256xi1> to vector<1x256xi1>
    %16 = vector.broadcast %15 : vector<1x256xi1> to vector<4x256xi1>
    %17 = vector.broadcast %cst : f32 to vector<4x256xf32>
    %18 = arith.select %16, %14, %17 : vector<4x256xi1>, vector<4x256xf32>
    %19 = vector.extract_strided_slice %18 {offsets = [0, 255], sizes = [4, 1], strides = [1, 1]} : vector<4x256xf32> to vector<4x1xf32>
    %20 = vector.extract_strided_slice %18 {offsets = [0, 0], sizes = [4, 255], strides = [1, 1]} : vector<4x256xf32> to vector<4x255xf32>
    %21 = tpu.concatenate %19, %20 in 1 : vector<4x1xf32>, vector<4x255xf32> -> vector<4x256xf32>
    %c1_i32 = arith.constant 1 : i32
    %22 = vector.broadcast %c1_i32 : i32 to vector<1x256xi32>
    %23 = arith.cmpi sge, %7, %22 : vector<1x256xi32>
    %24 = arith.maximumf %18, %21 : vector<4x256xf32>
    %25 = vector.shape_cast %23 : vector<1x256xi1> to vector<1x256xi1>
    %26 = vector.broadcast %25 : vector<1x256xi1> to vector<4x256xi1>
    %27 = arith.select %26, %24, %18 : vector<4x256xi1>, vector<4x256xf32>
    %28 = vector.extract_strided_slice %27 {offsets = [0, 254], sizes = [4, 2], strides = [1, 1]} : vector<4x256xf32> to vector<4x2xf32>
    %29 = vector.extract_strided_slice %27 {offsets = [0, 0], sizes = [4, 254], strides = [1, 1]} : vector<4x256xf32> to vector<4x254xf32>
    %30 = tpu.concatenate %28, %29 in 1 : vector<4x2xf32>, vector<4x254xf32> -> vector<4x256xf32>
    %c2_i32 = arith.constant 2 : i32
    %31 = vector.broadcast %c2_i32 : i32 to vector<1x256xi32>
    %32 = arith.cmpi sge, %7, %31 : vector<1x256xi32>
    %33 = arith.maximumf %27, %30 : vector<4x256xf32>
    %34 = vector.shape_cast %32 : vector<1x256xi1> to vector<1x256xi1>
    %35 = vector.broadcast %34 : vector<1x256xi1> to vector<4x256xi1>
    %36 = arith.select %35, %33, %27 : vector<4x256xi1>, vector<4x256xf32>
    %37 = vector.extract_strided_slice %36 {offsets = [0, 252], sizes = [4, 4], strides = [1, 1]} : vector<4x256xf32> to vector<4x4xf32>
    %38 = vector.extract_strided_slice %36 {offsets = [0, 0], sizes = [4, 252], strides = [1, 1]} : vector<4x256xf32> to vector<4x252xf32>
    %39 = tpu.concatenate %37, %38 in 1 : vector<4x4xf32>, vector<4x252xf32> -> vector<4x256xf32>
    %c4_i32 = arith.constant 4 : i32
    %40 = vector.broadcast %c4_i32 : i32 to vector<1x256xi32>
    %41 = arith.cmpi sge, %7, %40 : vector<1x256xi32>
    %42 = arith.maximumf %36, %39 : vector<4x256xf32>
    %43 = vector.shape_cast %41 : vector<1x256xi1> to vector<1x256xi1>
    %44 = vector.broadcast %43 : vector<1x256xi1> to vector<4x256xi1>
    %45 = arith.select %44, %42, %36 : vector<4x256xi1>, vector<4x256xf32>
    %46 = vector.extract_strided_slice %45 {offsets = [0, 248], sizes = [4, 8], strides = [1, 1]} : vector<4x256xf32> to vector<4x8xf32>
    %47 = vector.extract_strided_slice %45 {offsets = [0, 0], sizes = [4, 248], strides = [1, 1]} : vector<4x256xf32> to vector<4x248xf32>
    %48 = tpu.concatenate %46, %47 in 1 : vector<4x8xf32>, vector<4x248xf32> -> vector<4x256xf32>
    %c8_i32 = arith.constant 8 : i32
    %49 = vector.broadcast %c8_i32 : i32 to vector<1x256xi32>
    %50 = arith.cmpi sge, %7, %49 : vector<1x256xi32>
    %51 = arith.maximumf %45, %48 : vector<4x256xf32>
    %52 = vector.shape_cast %50 : vector<1x256xi1> to vector<1x256xi1>
    %53 = vector.broadcast %52 : vector<1x256xi1> to vector<4x256xi1>
    %54 = arith.select %53, %51, %45 : vector<4x256xi1>, vector<4x256xf32>
    %cst_2 = arith.constant 0.000000e+00 : f32
    %55 = vector.shape_cast %10 : vector<1x256xi1> to vector<1x256xi1>
    %56 = vector.broadcast %55 : vector<1x256xi1> to vector<4x256xi1>
    %57 = vector.broadcast %cst_2 : f32 to vector<4x256xf32>
    %58 = arith.select %56, %54, %57 : vector<4x256xi1>, vector<4x256xf32>
    %c0_3 = arith.constant 0 : index
    %c0_4 = arith.constant 0 : index
    %c0_5 = arith.constant 0 : index
    %59 = vector.load %arg3[%c0_3, %c0_4, %c0_5] : memref<1x4x256xf32, #tpu.memory_space<vmem>>, vector<1x4x256xf32>
    %60 = vector.shape_cast %59 : vector<1x4x256xf32> to vector<4x256xf32>
    %61 = vector.shape_cast %58 : vector<4x256xf32> to vector<1x4x256xf32>
    tpu.vector_store %arg3[%c0_3, %c0_4, %c0_5], %61 {strides = array<i32>} : memref<1x4x256xf32, #tpu.memory_space<vmem>>, vector<1x4x256xf32>,
    return
  }
  func.func @transform_0(%arg0: i32, %arg1: i32) -> (i32, i32, i32) {
    %c0_i32 = arith.constant 0 : i32
    %c0_i32_0 = arith.constant 0 : i32
    return %arg0, %arg1, %c0_i32 : i32, i32, i32
  }
  func.func @transform_1(%arg0: i32, %arg1: i32) -> (i32, i32, i32) {
    %c0_i32 = arith.constant 0 : i32
    %c0_i32_0 = arith.constant 0 : i32
    return %arg0, %arg1, %c0_i32 : i32, i32, i32
  }
}

</mosaic_0001>

<bundles_post_ra>
// kernel: tpu_custom_call.1
= control target key start
LH: loop header
LB: loop body
LE: loop exit
PB: predicated region body
PF: predicated region fallthrough
CT: control target
= control target key end

     0   :  { %6 = vsyncpa [#allocation3], 0  ;;  %s128_s0 = inlined_call_operand.hbm [shape: f32[8,128], index: 0, kind: input, shape index: {}]   ;;  %s129_s1 = inlined_call_operand.hbm [shape: f32[8,128], index: 1, kind: output, shape index: {}]  }
   0x1   :  { %7 = vsyncpa [#allocation4], 0  ;;  %s91_s6 = smov [#allocation2]   ;;  %s43_s10 = scalar_lea.hbm %s128_s0, 128 }
   0x2   :  { %s14_s7 = sshll.u32 %s91_s6, 4  ;;  %p44_p0 = scmp.ne.s32.totalorder %s128_s0, %s43_s10  ;;  %s15_s7 = int_to_ptr.vmem [resolvable:$true] %s14_s7 }
   0x3   :  { %p47_p1 = scmp.lt.u32.totalorder %s43_s10, %s128_s0 }
   0x5   :  { %p49_p2 = pnand %p47_p1, %p44_p0 }
   0x7   :  { %52 = shalt.err (!%p49_p2)
}
   0x8   :  { %s53_s15 = scalar_lea.vmem %s15_s7, 128  ;;  %p58_p4 = scmp.lt.s32.totalorder %s15_s7, %s15_s7 }
   0x9   :  { %p54_p3 = scmp.ne.s32.totalorder %s15_s7, %s53_s15  ;;  %p59_p5 = scmp.lt.s32.totalorder %s53_s15, %s53_s15 }
   0xb   :  { %p60_p6 = por %p59_p5, %p58_p4 }
   0xd   :  { %p61_p7 = pnand %p60_p6, %p54_p3 }
   0xf   :  { %64 = shalt.err (!%p61_p7)
}
  0x10   :  { %17 = dma.hbm_to_vmem [thread:$0]  %s128_s0, 128, %s15_s7, [#allocation3]  }
  0x11   :  { %87 = dma.done.wait [#allocation3], 128  }
  0x12   :  { %88 = vsyncadd [#allocation3], 4294967168  ;;  %v21_v0 = vld [vmem:[#allocation2] sm:$0xff]  ;;  %s92_s18 = smov 1   ;;  %s93_s19 = smov [#allocation5]  }
  0x13   :  { %22 = vrot.lane.b32.xlu0 %v21_v0, %s92_s18  ;;  %s31_s20 = sshll.u32 %s93_s19, 4  ;;  %s32_s20 = int_to_ptr.vmem [resolvable:$true] %s31_s20 }
  0x14   :  { %s65_s21 = scalar_lea.vmem %s32_s20, 128  ;;  %p70_p9 = scmp.lt.s32.totalorder %s32_s20, %s32_s20 }
  0x15   :  { %p66_p8 = scmp.ne.s32.totalorder %s32_s20, %s65_s21  ;;  %p71_p10 = scmp.lt.s32.totalorder %s65_s21, %s65_s21 }
  0x17   :  { %p72_p11 = por %p71_p10, %p70_p9 }
  0x19   :  { %p73_p12 = pnand %p72_p11, %p66_p8 }
  0x85   :  { %v23_v1 = vpop.permute.xlu0 %22 }
  0x86   :  { %24 = vst [vmem:[#allocation5] sm:$0xff] %v23_v1 }
  0x87   :  { %76 = shalt.err (!%p73_p12)
}
  0x88   :  { %s77_s0 = scalar_lea.hbm %s129_s1, 128 }
  0x89   :  { %p78_p13 = scmp.ne.s32.totalorder %s129_s1, %s77_s0  ;;  %p81_p0 = scmp.lt.u32.totalorder %s77_s0, %s129_s1 }
  0x8b   :  { %p83_p1 = pnand %p81_p0, %p78_p13 }
  0x8d   :  { %86 = shalt.err (!%p83_p1)
}
  0x8e   :  { %34 = dma.vmem_to_hbm [thread:$0]  %s32_s20, 128, %s129_s1, [#allocation4]  }
  0x8f   :  { %89 = dma.done.wait [#allocation4], 128  }
  0x90   :  { %90 = vsyncadd [#allocation4], 4294967168 }
  0x91   :  { %38 = vsyncpa [#allocation3], 1 }
  0x92   :  { %39 = vsyncpa [#allocation4], 1 }

// kernel: tpu_custom_call.1
= control target key start
LH: loop header
LB: loop body
LE: loop exit
PB: predicated region body
PF: predicated region fallthrough
CT: control target
= control target key end

     0   :  { %6 = vsyncpa [#allocation3], 0  ;;  %s816_s0 = inlined_call_operand.hbm [shape: f32[2,4,16], index: 0, kind: input, shape index: {}]   ;;  %s817_s1 = inlined_call_operand.hbm [shape: f32[2,4,256], index: 1, kind: output, shape index: {}]  }
   0x1   :  { %8 = vsyncpa [#allocation3 + $0x1], 0 }
   0x2   :  { %9 = vsyncpa [#allocation4], 0 }
   0x3   :  { %11 = vsyncpa [#allocation4 + $0x1], 0  ;;  %s614_s6 = smov 0   ;;  %s616_s7 = smov 0  }
   0x4   :  { %s618_s8 = smov 0   ;;  %s620_s9 = smov 0  }
   0x5   :  { %s622_s10 = smov 0   ;;  %s624_s11 = smov 0  }
   0x6 LB: > { %s395_s12 = sadd.s32 4294967295, %s592_s11   ;;  %s396_s13 = sadd.s32 4294967294, %s592_s11   ;;  %s592_s11 = sphi %s624_s11, %s17_s11   ;;  %s588_s10 = sphi %s622_s10, %s837_s10   ;;  %s584_s9 = sphi %s620_s9, %s836_s9   ;;  %s580_s8 = sphi %s618_s8, %s835_s8   ;;  %s576_s7 = sphi %s616_s7, %s834_s7   ;;  %s572_s6 = sphi %s614_s6, %s833_s6  }
   0x7   : > { %s29_s14 = sadd.s32 1, %s588_s10  ;;  %s38_s15 = sadd.s32 1, %s580_s8 }
   0x8   : > { %p31_p0 = scmp.ge.s32.totalorder %s29_s14, 2  ;;  %p45_p1 = scmp.ne.s32.totalorder %s580_s8, %s576_s7 }
   0x9   : > { %p46_p2 = scmp.eq.s32.totalorder %s592_s11, 0  ;;  %p51_p3 = scmp.ne.s32.totalorder %s576_s7, %s572_s6 }
   0xa   : > { %s839_s14 = smov (%p31_p0, %s29_s14), 0  ;;  %p52_p5 = scmp.eq.s32.totalorder %s395_s12, 0 }
   0xb   : > { %p655_p4 = por %p46_p2, %p45_p1  ;;  %s33_s17 = ssub.s32 %s588_s10, %s839_s14 }
   0xc   : > { %p77_p6 = scmp.eq.s32.totalorder %s395_s12, 1  ;;  %p36_p7 = scmp.eq.s32.totalorder %s33_s17, 0 }
   0xd   : > { %p661_p8 = por %p52_p5, %p51_p3  ;;  %p83_p10 = scmp.eq.s32.totalorder %s396_s13, 1 }
   0xe   : > { %p665_p9 = por %p77_p6, %p45_p1  ;;  %p422_p13 = scmp.lt.s32.totalorder %s592_s11, 2 }
   0xf   : > { %s670_s20 = scalar_select %p36_p7, %s580_s8, %s38_s15  }
  0x10   : > { %s821_s19 = scalar_select %p665_p9, 1, 0 }
  0x11   : > { %p672_p11 = por %p83_p10, %p51_p3  ;;  %s103_s22 = sand.u32 1, %s580_s8  }
  0x12   : > { %s399_s23 = sshll.u32 %s103_s22, 2  ;;  %s400_s24 = sshll.u32 %s588_s10, 6 }
  0x13   : > { %s822_s21 = scalar_select %p672_p11, 1, 0 }
  0x14   : > { %s683_s27 = scalar_lea.hbm %s816_s0, %s400_s24  ;;  %s107_s28 = scalar_lea.vmem [#allocation2], %s399_s23 }
  0x15   : > { %s115_s29 = sshll.u32 %s107_s28, 4  ;;  %p689_p0 = pnand %p422_p13, %p655_p4  ;;  %s685_s29 = int_to_ptr.vmem [resolvable:$true] %s115_s29 }
  0x16   : > { %s104_s2 = scalar_lea.sflag [#allocation3], %s103_s22  ;;  %s480_s3 = scalar_lea.hbm %s683_s27, 64 }
  0x17   : > { %p481_p3 = scmp.ne.s32.totalorder %s683_s27, %s480_s3  ;;  %p482_p5 = pneg %p689_p0 }
  0x18   : > { %s485_s12 = scalar_lea.hbm %s816_s0, 128  ;;  %p486_p4 = scmp.lt.u32.totalorder %s683_s27, %s816_s0 }
  0x19   : > { %p483_p6 = pnand %p482_p5, %p481_p3  ;;  %p487_p10 = scmp.lt.u32.totalorder %s485_s12, %s480_s3 }
  0x1a   : > { %p489_p12 = scmp.lt.u32.totalorder %s480_s3, %s683_s27 }
  0x1b   : > { %p484_p7 = pneg %p483_p6  ;;  %p488_p13 = por %p487_p10, %p486_p4 }
  0x1d   : > { %p490_p1 = por %p489_p12, %p488_p13 }
  0x1f   : > { %p491_p2 = pnand %p490_p1, %p484_p7 }
  0x21   : > { %494 = shalt.err (!%p491_p2)
}
  0x22   : > { %s495_s16 = scalar_lea.vmem %s685_s29, 64  ;;  %s594_s17 = smov [#allocation2]  }
  0x23   : > { %p496_p3 = scmp.ne.s32.totalorder %s685_s29, %s495_s16  ;;  %s500_s22 = sshll.u32 %s594_s17, 4  ;;  %s501_s22 = int_to_ptr.vmem [resolvable:$false] %s500_s22 }
  0x24   : > { %s502_s23 = scalar_lea.vmem %s501_s22, 128  ;;  %p503_p9 = scmp.lt.s32.totalorder %s685_s29, %s501_s22 }
  0x25   : > { %p498_p6 = pnand %p496_p3, %p482_p5  ;;  %p504_p4 = scmp.lt.s32.totalorder %s502_s23, %s495_s16 }
  0x27   : > { %p499_p11 = pneg %p498_p6  ;;  %p505_p10 = por %p504_p4, %p503_p9 }
  0x29   : > { %p506_p12 = pnand %p505_p10, %p499_p11 }
  0x2b   : > { %509 = shalt.err (!%p506_p12)
}
  0x2c   : > { %417 = dma.hbm_to_vmem [thread:$0]  (!%p689_p0), %s683_s27, 64, %s685_s29, %s104_s2  }
  0x2d   : > { %p824_p1 = scmp.lt.s32.totalorder %s592_s11, 3  ;;  %p825_p2 = scmp.ge.s32.totalorder %s592_s11, 1 }
  0x2f   : > { %p121_p5 = pnand %p825_p2, %p824_p1 }
  0x30   : > { %s725_s24 = sand.u32 (!%p121_p5), 1, %s576_s7  }
  0x31   : > { %124 = sbr.rel (%p121_p5) target bundleno = 910 (0x38e), region = 24  ;;  %s402_s25 = sshll.u32 (!%p121_p5), %s725_s24, 2 }
  0x32   : > { %s127_s26 = scalar_lea.sflag (!%p121_p5), [#allocation3], %s725_s24  ;;  %s130_s28 = scalar_lea.vmem (!%p121_p5), [#allocation2], %s402_s25 }
  0x38   : > { %563 = dma.done.wait (%p661_p8), %s127_s26, 64  }
  0x39   : > { %565 = vsyncadd (%p661_p8), %s127_s26, 4294967232  ;;  %v150_v0 = vlaneseq  ;;  %s595_s27 = smov 16   ;;  %v149_v2 = vld [vmem:[%s130_s28] sm:$0xf]  ;;  %vm155_vm0 = vcmask 130048   ;;  %s596_s29 = smov 32  }
  0x3a   : > { %vm159_vm1 = vcmask 261120   ;;  %s597_s30 = smov 64   ;;  %vm163_vm2 = vcmask 523264   ;;  %v598_v17 = vmov 0   ;;  %s599_s18 = smov 1   ;;  %vm204_vm11 = vcmask 7168  }
  0x3b   : > { %v151_v1 = vand.u32 127, %v150_v0  ;;  %v186_v11 = vshrl.u32 %v150_v0, 7  ;;  %s600_s2 = smov 2   ;;  %vm227_vm13 = vcmask 15360   ;;  %s601_s3 = smov 4   ;;  %vm250_vm15 = vcmask 31744  }
  0x3c   : > { %s602_s4 = smov 8   ;;  %s403_s5 = sshll.u32 %s725_s24, 3 }
  0x3d   : > { %153 = vrot.lane.b32.xlu0 %v151_v1, %s595_s27  ;;  %v733_v12 = vsub.s32 0, %v186_v11  ;;  %v152_v14 = vadd.s32 128, %v151_v1  ;;  %s409_s12 = sshll.u32 %s584_s9, 7  ;;  %s148_s13 = scalar_lea.vmem [#allocation5], %s403_s5 }
  0x3e   : > { %s313_s15 = sshll.u32 %s148_s13, 4  ;;  %s767_s22 = scalar_lea.hbm %s817_s1, %s409_s12  ;;  %s769_s15 = int_to_ptr.vmem [resolvable:$true] %s313_s15 }
  0x3f   : > { %s297_s9 = scalar_lea.sflag [#allocation4], %s725_s24  ;;  %s510_s23 = scalar_lea.vmem %s769_s15, 128 }
  0x40   : > { %p511_p8 = scmp.ne.s32.totalorder %s769_s15, %s510_s23  ;;  %p830_p9 = scmp.ne.s32.totalorder %s821_s19, 0 }
  0x41   : > { %169 = vrot.lane.b32.xlu0 %v149_v2, %s595_s27  ;;  %s603_s25 = smov [#allocation5]  }
  0x42   : > { %p512_p11 = pnand %p511_p8, %p830_p9  ;;  %s514_s26 = sshll.u32 %s603_s25, 4  ;;  %s515_s26 = int_to_ptr.vmem [resolvable:$false] %s514_s26 }
  0x43   : > { %s516_s28 = scalar_lea.vmem %s515_s26, 256  ;;  %p517_p7 = scmp.lt.s32.totalorder %s769_s15, %s515_s26 }
  0x44   : > { %p513_p0 = pneg %p512_p11  ;;  %p518_p13 = scmp.lt.s32.totalorder %s516_s28, %s510_s23 }
  0x46   : > { %p519_p3 = por %p518_p13, %p517_p7 }
  0x48   : > { %p520_p6 = pnand %p519_p3, %p513_p0 }
  0xaf   : > { %v154_v3 = vpop.permute.xlu0 %153 }
  0xb0   : > { %v156_v4 = vsel %vm155_vm0, %v151_v1, %v154_v3 }
  0xb1   : > { %157 = vrot.lane.b32.xlu1 %v156_v4, %s596_s29 }
  0xb3   : > { %v170_v5 = vpop.permute.xlu0 %169 }
  0xb4   : > { %v172_v6 = vsel %vm155_vm0, %v149_v2, %v170_v5 }
  0xb5   : > { %174 = vrot.lane.b32.xlu1 %v172_v6, %s596_s29 }
 0x123   : > { %v158_v7 = vpop.permute.xlu1 %157 }
 0x124   : > { %v160_v8 = vsel %vm159_vm1, %v156_v4, %v158_v7 }
 0x125   : > { %161 = vrot.lane.b32.xlu0 %v160_v8, %s597_s30 }
 0x127   : > { %v175_v9 = vpop.permute.xlu1 %174 }
 0x128   : > { %v177_v10 = vsel %vm159_vm1, %v172_v6, %v175_v9  ;;  %vm273_vm1 = vcmask 64512  }
 0x129   : > { %179 = vrot.lane.b32.xlu1 %v177_v10, %s597_s30 }
 0x197   : > { %v162_v13 = vpop.permute.xlu0 %161 }
 0x198   : > { %v164_v15 = vsel %vm163_vm2, %v160_v8, %v162_v13 }
 0x199   : > { %vm278_vm3 = vcmp.ge.s32.totalorder %v164_v15, 8  ;;  %v165_v16 = vmul.u32 17, %v164_v15  ;;  %vm209_vm4 = vcmp.ge.s32.totalorder %v164_v15, 1  ;;  %vm232_vm5 = vcmp.ge.s32.totalorder %v164_v15, 2 }
 0x19a   : > { %v736_v18 = vsel %vm278_vm3, 1, %v598_v17  ;;  %v212_v19 = vsel %vm209_vm4, 1, %v598_v17  ;;  %v235_v20 = vsel %vm232_vm5, 1, %v598_v17  ;;  %vm255_vm6 = vcmp.ge.s32.totalorder %v164_v15, 4 }
 0x19b   : > { %vm167_vm7 = vcmp.ge.s32.totalorder %v165_v16, %v152_v14  ;;  %vm166_vm8 = vcmp.ge.s32.totalorder %v165_v16, %v151_v1  ;;  %v216_v21 = vrot.slane %v212_v19, %v733_v12  ;;  %v239_v22 = vrot.slane %v235_v20, %v733_v12  ;;  %v180_v23 = vpop.permute.xlu1 %179 }
 0x19c   : > { %v184_v24 = vsel %vm167_vm7, 1, %v598_v17  ;;  %v183_v25 = vsel %vm166_vm8, 1, %v598_v17  ;;  %v258_v26 = vsel %vm255_vm6, 1, %v598_v17  ;;  %v285_v30 = vrot.slane %v736_v18, %v733_v12 }
 0x19d   : > { %v192_v27 = vrot.slane %v184_v24, %v733_v12  ;;  %v188_v28 = vrot.slane %v183_v25, %v733_v12  ;;  %v262_v29 = vrot.slane %v258_v26, %v733_v12  ;;  %v182_v31 = vsel %vm163_vm2, %v177_v10, %v180_v23 }
 0x19e   : > { %vm217_vm12 = vcmp.eq.s32.totalorder %v216_v21, 1  ;;  %vm240_vm14 = vcmp.eq.s32.totalorder %v239_v22, 1  ;;  %vm286_vm2 = vcmp.eq.s32.totalorder %v285_v30, 1 }
 0x19f   : > { %vm746_vm9 = vcmp.eq.s32.totalorder %v192_v27, 1  ;;  %vm750_vm10 = vcmp.eq.s32.totalorder %v188_v28, 1  ;;  %vm263_vm0 = vcmp.eq.s32.totalorder %v262_v29, 1 }
 0x1a0   : > { %v196_v34 = vsel %vm746_vm9, %v182_v31, -inf  ;;  %v195_v35 = vsel %vm750_vm10, %v182_v31, -inf }
 0x1a1   : > { %198 = vrot.lane.b32.xlu0 %v196_v34, %s599_s18  ;;  %202 = vrot.lane.b32.xlu1 %v195_v35, %s599_s18 }
 0x213   : > { %v199_v36 = vpop.permute.xlu0 %198  ;;  %v203_v37 = vpop.permute.xlu1 %202 }
 0x214   : > { %v205_v38 = vsel %vm204_vm11, %v203_v37, %v199_v36  ;;  %v208_v39 = vsel %vm204_vm11, %v199_v36, %v203_v37 }
 0x215   : > { %v210_v40 = vmax.f32 %v195_v35, %v208_v39  ;;  %v211_v41 = vmax.f32 %v196_v34, %v205_v38 }
 0x217   : > { %v218_v42 = vsel %vm217_vm12, %v210_v40, %v195_v35  ;;  %v219_v43 = vsel %vm217_vm12, %v211_v41, %v196_v34 }
 0x218   : > { %225 = vrot.lane.b32.xlu1 %v218_v42, %s600_s2  ;;  %221 = vrot.lane.b32.xlu0 %v219_v43, %s600_s2 }
 0x28a   : > { %v226_v44 = vpop.permute.xlu1 %225  ;;  %v222_v45 = vpop.permute.xlu0 %221 }
 0x28b   : > { %v228_v46 = vsel %vm227_vm13, %v226_v44, %v222_v45  ;;  %v231_v47 = vsel %vm227_vm13, %v222_v45, %v226_v44 }
 0x28c   : > { %v233_v48 = vmax.f32 %v218_v42, %v231_v47  ;;  %v234_v49 = vmax.f32 %v219_v43, %v228_v46 }
 0x28e   : > { %v241_v50 = vsel %vm240_vm14, %v233_v48, %v218_v42  ;;  %v242_v51 = vsel %vm240_vm14, %v234_v49, %v219_v43 }
 0x28f   : > { %248 = vrot.lane.b32.xlu1 %v241_v50, %s601_s3  ;;  %244 = vrot.lane.b32.xlu0 %v242_v51, %s601_s3 }
 0x301   : > { %v249_v52 = vpop.permute.xlu1 %248  ;;  %v245_v53 = vpop.permute.xlu0 %244 }
 0x302   : > { %v251_v54 = vsel %vm250_vm15, %v249_v52, %v245_v53  ;;  %v254_v55 = vsel %vm250_vm15, %v245_v53, %v249_v52 }
 0x303   : > { %v256_v56 = vmax.f32 %v241_v50, %v254_v55  ;;  %v257_v57 = vmax.f32 %v242_v51, %v251_v54 }
 0x305   : > { %v264_v58 = vsel %vm263_vm0, %v256_v56, %v241_v50  ;;  %v265_v59 = vsel %vm263_vm0, %v257_v57, %v242_v51 }
 0x306   : > { %271 = vrot.lane.b32.xlu1 %v264_v58, %s602_s4  ;;  %267 = vrot.lane.b32.xlu0 %v265_v59, %s602_s4 }
 0x378   : > { %v272_v60 = vpop.permute.xlu1 %271  ;;  %v268_v61 = vpop.permute.xlu0 %267 }
 0x379   : > { %v274_v62 = vsel %vm273_vm1, %v272_v60, %v268_v61  ;;  %v277_v63 = vsel %vm273_vm1, %v268_v61, %v272_v60 }
 0x37a   : > { %v279_v0 = vmax.f32 %v264_v58, %v277_v63  ;;  %v280_v1 = vmax.f32 %v265_v59, %v274_v62 }
 0x37c   : > { %v287_v2 = vsel %vm286_vm2, %v279_v0, %v264_v58  ;;  %v288_v3 = vsel %vm286_vm2, %v280_v1, %v265_v59 }
 0x37d   : > { %v289_v4 = vsel %vm750_vm10, %v287_v2, 0.0  ;;  %v290_v5 = vsel %vm746_vm9, %v288_v3, 0.0 }
 0x37e   : > { %v293_v6 = vcombine.low %v289_v4, %v290_v5 }
 0x380   : > { %295 = vst [vmem:[%s148_s13] sm:$0xff] %v293_v6 }
 0x381   : > { %523 = shalt.err (!%p520_p6)
}
 0x382   : > { %s524_s24 = scalar_lea.hbm %s767_s22, 128  ;;  %s528_s30 = scalar_lea.hbm %s817_s1, 256 }
 0x383   : > { %p525_p4 = scmp.ne.s32.totalorder %s767_s22, %s524_s24  ;;  %p529_p1 = scmp.lt.u32.totalorder %s767_s22, %s817_s1 }
 0x384   : > { %p530_p2 = scmp.lt.u32.totalorder %s528_s30, %s524_s24  ;;  %p532_p8 = scmp.lt.u32.totalorder %s524_s24, %s767_s22 }
 0x385   : > { %p526_p10 = pnand %p525_p4, %p830_p9 }
 0x386   : > { %p531_p5 = por %p530_p2, %p529_p1 }
 0x387   : > { %p527_p12 = pneg %p526_p10 }
 0x388   : > { %p533_p11 = por %p532_p8, %p531_p5 }
 0x38a   : > { %p534_p0 = pnand %p533_p11, %p527_p12 }
 0x38c   : > { %537 = shalt.err (!%p534_p0)
}
 0x38d   : > { %412 = dma.vmem_to_hbm [thread:$0]  (%p830_p9), %s769_s15, 128, %s767_s22, %s297_s9  }
 0x38e PF: > { %s325_s3 = sand.u32 1, %s572_s6   ;;  %p831_p7 = scmp.ne.s32.totalorder %s822_s21, 0 }
 0x38f   : > { %p832_p13 = scmp.ge.s32.totalorder %s592_s11, 2  ;;  %s326_s4 = scalar_lea.sflag [#allocation4], %s325_s3 }
 0x391   : > { %p419_p3 = pnand %p832_p13, %p831_p7 }
 0x393   : > { %567 = dma.done.wait (!%p419_p3), %s326_s4, 128  }
 0x394   : > { %569 = vsyncadd (!%p419_p3), %s326_s4, 4294967168  ;;  %s17_s11 = sadd.s32 1, %s592_s11   ;;  %s833_s6 = smov %s576_s7 }
 0x395   : > { %p14_p6 = scmp.ge.s32.totalorder %s17_s11, 4   ;;  %s834_s7 = smov %s580_s8 }
 0x396   : > { %s835_s8 = smov %s670_s20  ;;  %s836_s9 = smov %s588_s10 }
 0x397   : > { %s837_s10 = smov %s839_s14  ;;  %16 = sbr.rel (!%p14_p6) target bundleno = 6 (0x6), region = 69 }
 0x39e   :  { %331 = vsyncpa [#allocation3], 1 }
 0x39f   :  { %333 = vsyncpa [#allocation3 + $0x1], 1 }
 0x3a0   :  { %334 = vsyncpa [#allocation4], 1 }
 0x3a1   :  { %336 = vsyncpa [#allocation4 + $0x1], 1 }

</bundles_post_ra>
